<compile_context>
chip_gen: v5e
topology: v5e:2x2
jax: 0.10.0
libtpu: 0.0.40
codegen_flags: <defaults>
</compile_context>

<pallas_src>
import functools
import math

import jax
import jax.numpy as jnp
from jax.experimental import pallas as pl
from jax.experimental.pallas import tpu as pltpu


def _round_up(x, m):
    return ((x + m - 1) // m) * m


def _pad2(a, rows, cols):
    r, c = a.shape
    if r == rows and c == cols:
        return a  # already aligned: avoid an extra HBM round trip
    return jnp.pad(a, ((0, rows - r), (0, cols - c)))


# ----------------------------- kernels --------------------------------------


def _linear_resident_kernel(x_ref, w_ref, b_ref, o_ref):
    # Weight (F_pad, C_pad) and bias have constant index maps -> DMA'd once and
    # VMEM-resident across all batch tiles. Only x streams from HBM.
    o_ref[...] = (
        jnp.dot(x_ref[...], w_ref[...], preferred_element_type=jnp.float32)
        + b_ref[...]
    ).astype(o_ref.dtype)


def _linear_tiled_kernel(x_ref, w_ref, b_ref, o_ref):
    # Grid = (batch tile i, output-column tile j, reduction tile k); k is last.
    k = pl.program_id(2)

    @pl.when(k == 0)
    def _init():
        # Seed the VMEM-resident f32 output block with the bias; subsequent k
        # steps accumulate straight into o_ref (no scratch, no finalize pass).
        o_ref[...] = jnp.broadcast_to(b_ref[...], o_ref.shape).astype(o_ref.dtype)

    o_ref[...] += jnp.dot(
        x_ref[...], w_ref[...], preferred_element_type=jnp.float32
    )


# ----------------------------- wrapper ---------------------------------------


@functools.partial(
    jax.jit,
    static_argnames=("num_classes", "tb_max", "tk_max", "tn_max", "resident_budget"),
)
def linear_forward_prepacked(
    x,                 # (B, F), native dtype (no forced upcast)
    w_packed,          # (F_pad, C_pad) = padded W^T, built once in __init__
    b_packed,          # (1, C_pad) f32, built once in __init__
    *,
    num_classes,
    tb_max=512,
    tk_max=512,
    tn_max=1024,
    resident_budget=20 * 1024 * 1024,
):
    B, F = x.shape
    F_pad, C_pad = w_packed.shape
    assert F <= F_pad, "packed weight feature dim must cover x feature dim"

    x_isz = jnp.dtype(x.dtype).itemsize
    w_isz = jnp.dtype(w_packed.dtype).itemsize
    o_isz = 4  # f32 output

    TB = min(tb_max, _round_up(B, 8))
    B_pad = _round_up(B, TB)
    x_p = _pad2(x, B_pad, F_pad)

    w_bytes = F_pad * C_pad * w_isz
    resident_working = (
        w_bytes + C_pad * 4                # resident weight + bias (single buffer)
        + 2 * TB * F_pad * x_isz           # double-buffered x tile
        + 2 * TB * C_pad * o_isz           # double-buffered out tile
    )

    if resident_working <= resident_budget:
        # --- Path A: weight fully VMEM-resident, no reduction grid axis ---
        # TODO(synk): when B fits a single tile, a second parallel C axis would
        # engage both TensorCores on v7x; omitted to keep the resident path simple.
        grid = (B_pad // TB,)
        flops = 2 * B_pad * F_pad * C_pad
        bytes_accessed = (
            B_pad * F_pad * x_isz + w_bytes + C_pad * 4 + B_pad * C_pad * o_isz
        )
        out_p = pl.pallas_call(
            _linear_resident_kernel,
            out_shape=jax.ShapeDtypeStruct((B_pad, C_pad), jnp.float32),
            grid=grid,
            in_specs=[
                pl.BlockSpec((TB, F_pad), lambda i: (i, 0)),      # streams
                pl.BlockSpec((F_pad, C_pad), lambda i: (0, 0)),   # resident
                pl.BlockSpec((1, C_pad), lambda i: (0, 0)),       # resident
            ],
            out_specs=pl.BlockSpec((TB, C_pad), lambda i: (i, 0)),
            compiler_params=pltpu.CompilerParams(
                dimension_semantics=("parallel",),
                vmem_limit_bytes=int(
                    min(48 * 1024 * 1024,
                        max(2 * resident_working, 16 * 1024 * 1024))
                ),
            ),
            cost_estimate=pl.CostEstimate(
                flops=int(flops),
                transcendentals=0,
                bytes_accessed=int(bytes_accessed),
            ),
        )(x_p, w_packed, b_packed)
    else:
        # --- Path B: tile output columns (TN) and the reduction (TK) ---
        TK = math.gcd(F_pad, tk_max)   # multiple of 128 because F_pad is
        TN = math.gcd(C_pad, tn_max)   # multiple of 128 because C_pad is
        n_i, n_j, n_k = B_pad // TB, C_pad // TN, F_pad // TK
        grid = (n_i, n_j, n_k)
        tiled_working = 2 * (
            TB * TK * x_isz + TK * TN * w_isz + TN * 4 + TB * TN * o_isz
        )
        flops = 2 * B_pad * F_pad * C_pad
        bytes_accessed = (
            B_pad * F_pad * x_isz * n_j    # x re-streamed per column tile
            + w_bytes * n_i                # weight re-streamed per batch tile
            + C_pad * 4 * n_i
            + B_pad * C_pad * o_isz
        )
        out_p = pl.pallas_call(
            _linear_tiled_kernel,
            out_shape=jax.ShapeDtypeStruct((B_pad, C_pad), jnp.float32),
            grid=grid,
            in_specs=[
                pl.BlockSpec((TB, TK), lambda i, j, k: (i, k)),
                pl.BlockSpec((TK, TN), lambda i, j, k: (k, j)),
                pl.BlockSpec((1, TN), lambda i, j, k: (0, j)),
            ],
            out_specs=pl.BlockSpec((TB, TN), lambda i, j, k: (i, j)),
            compiler_params=pltpu.CompilerParams(
                dimension_semantics=("parallel", "parallel", "arbitrary"),
                vmem_limit_bytes=int(
                    min(48 * 1024 * 1024,
                        max(2 * tiled_working, 16 * 1024 * 1024))
                ),
            ),
            cost_estimate=pl.CostEstimate(
                flops=int(flops),
                transcendentals=0,
                bytes_accessed=int(bytes_accessed),
            ),
        )(x_p, w_packed, b_packed)

    return out_p[:B, :num_classes]


class LogModelPallas:
    """Mirror of the PyTorch Log_Model: one nn.Linear layer (forward only)."""

    def __init__(self, input_size, num_classes, key, dtype=jnp.float32):
        k_w, k_b = jax.random.split(key)
        bound = 1.0 / math.sqrt(input_size)
        self.weight = jax.random.uniform(
            k_w, (num_classes, input_size), jnp.float32, -bound, bound
        ).astype(dtype)
        self.bias = jax.random.uniform(
            k_b, (num_classes,), jnp.float32, -bound, bound
        ).astype(dtype)
        self.input_size = input_size
        self.num_classes = num_classes

        # Pre-transpose + zero-pad the weight/bias ONCE (perf review item #1).
        # C_pad aligned to 256 when large (v6e/v7x MXU width), else 128.
        F_pad = _round_up(input_size, 128)
        if num_classes >= 256:
            C_pad = _round_up(num_classes, 256)
        else:
            C_pad = _round_up(num_classes, 128)
        self.w_packed = (
            jnp.zeros((F_pad, C_pad), self.weight.dtype)
            .at[:input_size, :num_classes]
            .set(self.weight.T)
        )
        self.b_packed = (
            jnp.zeros((1, C_pad), jnp.float32)
            .at[0, :num_classes]
            .set(self.bias.astype(jnp.float32))
        )

    def __call__(self, x):
        lead = x.shape[:-1]
        x2 = x.reshape(-1, x.shape[-1])
        out = linear_forward_prepacked(
            x2, self.w_packed, self.b_packed, num_classes=self.num_classes
        )
        return out.reshape(*lead, self.num_classes)


if __name__ == "__main__":
    key = jax.random.PRNGKey(0)
    k_x, k_m = jax.random.split(key)

    batch = 8
    input_size = 32
    num_classes = 8

    x = jax.random.normal(k_x, (batch, input_size), jnp.float32)

    model = LogModelPallas(input_size, num_classes, k_m)
    out = jax.block_until_ready(model(x))

    # Reference check in plain JAX (same semantics as nn.Linear forward).
    ref = x @ model.weight.T + model.bias
    assert out.shape == (batch, num_classes)
    assert jnp.allclose(out, ref, atol=1e-5, rtol=1e-5), float(
        jnp.max(jnp.abs(out - ref))
    )

    print("KERNEL_OK")
</pallas_src>

<mosaic_0001>
module attributes {stable_mosaic.version = 11 : i64} {
  func.func @_linear_resident_kernel(%arg0: i32, %arg1: memref<8x128xf32, #tpu.memory_space<vmem>>, %arg2: memref<128x128xf32, #tpu.memory_space<vmem>>, %arg3: memref<1x128xf32, #tpu.memory_space<vmem>>, %arg4: memref<8x128xf32, #tpu.memory_space<vmem>>) attributes {dimension_semantics = [#tpu.dimension_semantics<parallel>], iteration_bounds = array<i64: 1>, scalar_prefetch = 0 : i64, scratch_operands = 0 : i64, tpu.core_type = #tpu.core_type<tc>, window_params = [{transform_indices = @transform_0, window_bounds = array<i64: 8, 128>}, {pipeline_mode = #tpu.pipeline_mode<synchronous>, transform_indices = @transform_1, window_bounds = array<i64: 128, 128>}, {pipeline_mode = #tpu.pipeline_mode<synchronous>, transform_indices = @transform_2, window_bounds = array<i64: 1, 128>}, {transform_indices = @transform_3, window_bounds = array<i64: 8, 128>}]} {
    %c0 = arith.constant 0 : index
    %c0_0 = arith.constant 0 : index
    %0 = vector.load %arg1[%c0, %c0_0] : memref<8x128xf32, #tpu.memory_space<vmem>>, vector<8x128xf32>
    %c0_1 = arith.constant 0 : index
    %c0_2 = arith.constant 0 : index
    %1 = vector.load %arg2[%c0_1, %c0_2] : memref<128x128xf32, #tpu.memory_space<vmem>>, vector<128x128xf32>
    %cst = arith.constant dense<0.000000e+00> : vector<8x128xf32>
    %2 = tpu.matmul %0, %1, %cst {dimension_numbers = #tpu.dot_dimension_numbers<[1], [0], [0], [1], [0, 0, 1, 1], [], []>} : vector<8x128xf32>, vector<128x128xf32>, vector<8x128xf32> -> vector<8x128xf32>
    %c0_3 = arith.constant 0 : index
    %c0_4 = arith.constant 0 : index
    %3 = vector.load %arg3[%c0_3, %c0_4] : memref<1x128xf32, #tpu.memory_space<vmem>>, vector<1x128xf32>
    %4 = vector.broadcast %3 : vector<1x128xf32> to vector<8x128xf32>
    %5 = arith.addf %2, %4 : vector<8x128xf32>
    %c0_5 = arith.constant 0 : index
    %c0_6 = arith.constant 0 : index
    %6 = vector.load %arg4[%c0_5, %c0_6] : memref<8x128xf32, #tpu.memory_space<vmem>>, vector<8x128xf32>
    tpu.vector_store %arg4[%c0_5, %c0_6], %5 {strides = array<i32>} : memref<8x128xf32, #tpu.memory_space<vmem>>, vector<8x128xf32>,
    return
  }
  func.func @transform_0(%arg0: i32) -> (i32, i32) {
    %c0_i32 = arith.constant 0 : i32
    %c0_i32_0 = arith.constant 0 : i32
    return %arg0, %c0_i32 : i32, i32
  }
  func.func @transform_1(%arg0: i32) -> (i32, i32) {
    %c0_i32 = arith.constant 0 : i32
    %c0_i32_0 = arith.constant 0 : i32
    %c0_i32_1 = arith.constant 0 : i32
    return %c0_i32, %c0_i32_0 : i32, i32
  }
  func.func @transform_2(%arg0: i32) -> (i32, i32) {
    %c0_i32 = arith.constant 0 : i32
    %c0_i32_0 = arith.constant 0 : i32
    %c0_i32_1 = arith.constant 0 : i32
    return %c0_i32, %c0_i32_0 : i32, i32
  }
  func.func @transform_3(%arg0: i32) -> (i32, i32) {
    %c0_i32 = arith.constant 0 : i32
    %c0_i32_0 = arith.constant 0 : i32
    return %arg0, %c0_i32 : i32, i32
  }
}

</mosaic_0001>

<bundles_post_ra>
// kernel: linear_forward_prepacked.1
= control target key start
LH: loop header
LB: loop body
LE: loop exit
PB: predicated region body
PF: predicated region fallthrough
CT: control target
= control target key end

     0   :  { %8 = vsyncpa [#allocation3], 0  ;;  %s183_s0 = inlined_call_operand.vmem [shape: f32[8,128], index: 0, kind: input, shape index: {}]   ;;  %s184_s1 = inlined_call_operand.hbm [shape: f32[128,128], index: 1, kind: input, shape index: {}]   ;;  %s185_s2 = inlined_call_operand.vmem [shape: f32[1,128], index: 2, kind: input, shape index: {}]   ;;  %s186_s3 = inlined_call_operand.hbm [shape: f32[8,128], index: 3, kind: output, shape index: {}]  }
   0x1   :  { %9 = vsyncpa [#allocation4], 0  ;;  %s16_s14 = sshll.u32 %s184_s1, 4  ;;  %s147_s15 = smov [#allocation2]   ;;  %s17_s14 = int_to_ptr.hbm [resolvable:$true] %s16_s14 }
   0x2   :  { %s18_s16 = sshll.u32 %s147_s15, 4  ;;  %s148_s17 = smov 128   ;;  %s19_s16 = int_to_ptr.vmem [resolvable:$true] %s18_s16 }
   0x3   :  { %s149_s18 = smov 8  }
   0x4   :  { %24 = dma.hbm_to_vmem [thread:$0]  %s17_s14, 2048, %s19_s16, [#allocation3], %s148_s17, %s148_s17, %s149_s18  }
   0x5   :  { %143 = dma.done.wait [#allocation3], 2048  }
   0x6   :  { %144 = vsyncadd [#allocation3], 4294965248  ;;  %v47_v0 = vld [vmem:[#allocation2 + $0x78] sm:$0xff]  ;;  %v46_v1 = vld [vmem:[#allocation2 + $0x70] sm:$0xff]  ;;  %s150_s22 = smov [#allocation5]   ;;  %s80_s26 = sshll.u32 %s186_s3, 4  ;;  %s81_s26 = int_to_ptr.hbm [resolvable:$true] %s80_s26 }
   0x7   :  { %52 = vmatpush.msra.mxu0 %v47_v0  ;;  %v45_v2 = vld [vmem:[#allocation2 + $0x68] sm:$0xff]  ;;  %v44_v3 = vld [vmem:[#allocation2 + $0x60] sm:$0xff]  ;;  %v43_v4 = vld [vmem:[#allocation2 + $0x58] sm:$0xff]  ;;  %s78_s23 = sshll.u32 %s150_s22, 4  ;;  %s79_s23 = int_to_ptr.vmem [resolvable:$true] %s78_s23 }
   0x8   :  { %v42_v5 = vld [vmem:[#allocation2 + $0x50] sm:$0xff]  ;;  %v41_v6 = vld [vmem:[#allocation2 + $0x48] sm:$0xff]  ;;  %v40_v7 = vld [vmem:[#allocation2 + $0x40] sm:$0xff] }
   0x9   :  { %53 = vmatpush.msra.mxu0 %v46_v1  ;;  %v39_v8 = vld [vmem:[#allocation2 + $0x38] sm:$0xff]  ;;  %v38_v9 = vld [vmem:[#allocation2 + $0x30] sm:$0xff]  ;;  %v37_v10 = vld [vmem:[#allocation2 + $0x28] sm:$0xff] }
   0xa   :  { %v36_v11 = vld [vmem:[#allocation2 + $0x20] sm:$0xff]  ;;  %v35_v12 = vld [vmem:[#allocation2 + $0x18] sm:$0xff]  ;;  %v34_v13 = vld [vmem:[#allocation2 + $0x10] sm:$0xff] }
   0xb   :  { %54 = vmatpush.msra.mxu0 %v45_v2  ;;  %v33_v14 = vld [vmem:[#allocation2 + $0x8] sm:$0xff]  ;;  %v32_v15 = vld [vmem:[#allocation2] sm:$0xff] }
   0xc   :  { %v31_v16 = vld [vmem:[%s183_s0] sm:$0xff] }
   0xd   :  { %55 = vmatpush.msra.mxu0 %v44_v3  ;;  %v94_v17 = vld [vmem:[%s185_s2] ss:$0 sm:$0xff] }
   0xf   :  { %56 = vmatpush.msra.mxu0 %v43_v4 }
  0x11   :  { %57 = vmatpush.msra.mxu0 %v42_v5 }
  0x13   :  { %58 = vmatpush.msra.mxu0 %v41_v6 }
  0x15   :  { %59 = vmatpush.msra.mxu0 %v40_v7 }
  0x17   :  { %60 = vmatpush.msra.mxu0 %v39_v8 }
  0x19   :  { %61 = vmatpush.msra.mxu0 %v38_v9 }
  0x1b   :  { %62 = vmatpush.msra.mxu0 %v37_v10 }
  0x1d   :  { %63 = vmatpush.msra.mxu0 %v36_v11 }
  0x1f   :  { %64 = vmatpush.msra.mxu0 %v35_v12 }
  0x21   :  { %65 = vmatpush.msra.mxu0 %v34_v13 }
  0x23   :  { %66 = vmatpush.msra.mxu0 %v33_v14 }
  0x25   :  { %67 = vmatpush.msra.mxu0 %v32_v15 }
  0x26   :  { %68 = vmatmul.f32.vlgmr.msra.gmra.mxu0 %v31_v16 }
  0xa3   :  { %v69_v18 = vpop.f32.mrf.mxu0 }
  0xa4   :  { %v70_v19 = vadd.f32 %v94_v17, %v69_v18 }
  0xa6   :  { %72 = vst [vmem:[#allocation5] sm:$0xff] %v70_v19 }
  0xa7   :  { %83 = dma.vmem_to_hbm [thread:$0]  %s79_s23, 128, %s81_s26, [#allocation4]  }
  0xa8   :  { %145 = dma.done.wait [#allocation4], 128  }
  0xa9   :  { %146 = vsyncadd [#allocation4], 4294967168 }
  0xaa   :  { %88 = vsyncpa [#allocation3], 1 }
  0xab   :  { %89 = vsyncpa [#allocation4], 1 }

</bundles_post_ra>
